<compile_context>
chip_gen: v7x
topology: tpu7x:2x2x1
jax: 0.10.0
libtpu: 0.0.40
codegen_flags: <defaults>
</compile_context>

<pallas_src>
import functools

import jax
import jax.numpy as jnp
from jax.experimental import pallas as pl
from jax.experimental.pallas import tpu as pltpu

LRELU_SLOPE = 0.2
BN_EPS = 1e-5
LANE = 128
_VMEM_HEADROOM = 16 << 20       # leave for Mosaic internal scratch / misc
_DEFAULT_VMEM = 64 << 20        # conservative (v7x per-TensorCore) if query fails


def _round_up(v, m):
    return (v + m - 1) // m * m


def _total_vmem_bytes():
    """Generation-aware VMEM capacity (v5e/v6e: 128 MiB, v7x: 64 MiB/TC)."""
    try:
        info = pltpu.get_tpu_info()
        for attr in ("vmem_capacity_bytes", "vmem_bytes", "vmem_size_bytes"):
            v = getattr(info, attr, None)
            if v:
                return int(v)
    except Exception:
        pass
    return _DEFAULT_VMEM


def _choose_tm(m, kpad, cpad, tm_req=None):
    """Row-tile targeting ~3 MiB streamed blocks; always a multiple of 8 (and of
    256 when tiled, so bf16 blocks are sublane-pack friendly)."""
    if tm_req is None:
        per_row = max(kpad * 2, cpad * 4)           # bytes/row of widest streamed block
        target = (3 << 20) // per_row
        target = max(256, min(2048, (target // 256) * 256))
    else:
        target = max(8, (tm_req // 8) * 8)
    tm = min(target, _round_up(m, 8))               # small problems -> single full tile
    return max(8, _round_up(tm, 8))


# ---------------------------------------------------------------------------
# Fused path: two sweeps over the row tiles.
#   phase 0: GEMM tile -> VMEM-resident f32 scratch, accumulate sum / sumsq
#   phase 1: compute scale/shift once, apply BN affine, tiled (pipelined) writeback
# ---------------------------------------------------------------------------
def _fused_kernel(p_ref, w_ref, g_ref, beta_ref, o_ref,
                  d_res, stats_ref, sc_ref, *, tm, m_total, eps):
    ph = pl.program_id(0)                       # 0 = GEMM+stats sweep, 1 = affine sweep
    i = pl.program_id(1)
    row = pl.multiple_of(i * tm, tm)

    @pl.when(jnp.logical_and(ph == 0, i == 0))
    def _():
        stats_ref[...] = jnp.zeros_like(stats_ref)

    @pl.when(ph == 0)
    def _():
        # Patches are already LeakyReLU'd (done once in XLA, pre-expansion).
        d = jnp.dot(p_ref[...], w_ref[...], preferred_element_type=jnp.float32)
        d_res[pl.ds(row, tm), :] = d
        stats_ref[...] += jnp.concatenate(
            [jnp.sum(d, axis=0, keepdims=True),
             jnp.sum(d * d, axis=0, keepdims=True)], axis=0)

    @pl.when(jnp.logical_and(ph == 1, i == 0))
    def _():
        inv_m = 1.0 / m_total
        mean_d = stats_ref[0:1, :] * inv_m
        var = stats_ref[1:2, :] * inv_m - mean_d * mean_d      # biased variance
        scale = jax.lax.rsqrt(var + eps) * g_ref[...]          # computed once
        sc_ref[0:1, :] = scale
        # conv bias is exactly absorbed by the mean subtraction -> no bias term.
        sc_ref[1:2, :] = beta_ref[...] - mean_d * scale

    @pl.when(ph == 1)
    def _():
        o_ref[...] = (d_res[pl.ds(row, tm), :] * sc_ref[0:1, :]
                      + sc_ref[1:2, :]).astype(o_ref.dtype)


# ---------------------------------------------------------------------------
# Fallback path (too large for VMEM residency): tiled GEMM + per-core partial
# stats (megacore-safe), tiny XLA reduce for scale/shift, then streaming affine.
# The pre-BN intermediate is stored in bf16 (stats already accumulated in f32).
# ---------------------------------------------------------------------------
def _gemm_stats_kernel(p_ref, w_ref, y_ref, stats_ref):
    i = pl.program_id(1)
    d = jnp.dot(p_ref[...], w_ref[...], preferred_element_type=jnp.float32)
    y_ref[...] = d.astype(y_ref.dtype)

    @pl.when(i == 0)
    def _():
        stats_ref[...] = jnp.zeros_like(stats_ref)

    stats_ref[...] += jnp.concatenate(
        [jnp.sum(d, axis=0, keepdims=True),
         jnp.sum(d * d, axis=0, keepdims=True)], axis=0)[None]


def _affine_kernel(y_ref, scale_ref, shift_ref, o_ref):
    o_ref[...] = (y_ref[...].astype(jnp.float32) * scale_ref[...]
                  + shift_ref[...]).astype(o_ref.dtype)


# ---------------------------------------------------------------------------
# im2col (XLA side).  LeakyReLU is applied here, once, BEFORE the KHxKW
# expansion, and the expansion is written in bf16.
# ---------------------------------------------------------------------------
def _im2col(x, kh, kw, stride, pad):
    """NCHW -> patches (N*Hout*Wout, KH*KW*Cin); matches conv_w.transpose(2,3,1,0)."""
    n, c, h, w = x.shape
    hout = (h + 2 * pad - kh) // stride + 1
    wout = (w + 2 * pad - kw) // stride + 1
    xh = jnp.transpose(x, (0, 2, 3, 1))                       # NHWC
    xh = jnp.where(xh > 0, xh, LRELU_SLOPE * xh).astype(jnp.bfloat16)   # LeakyReLU once
    xh = jnp.pad(xh, ((0, 0), (pad, pad), (pad, pad), (0, 0)))          # lrelu(0)=0 -> exact
    cols = [xh[:, i:i + stride * hout:stride, j:j + stride * wout:stride, :]
            for i in range(kh) for j in range(kw)]
    p = jnp.stack(cols, axis=3)                               # (N, Hout, Wout, KH*KW, Cin)
    return p.reshape(n * hout * wout, kh * kw * c), hout, wout


# ---------------------------------------------------------------------------
# Wrapper.
# ---------------------------------------------------------------------------
def encode_forward(x, conv_w, conv_b, bn_gamma, bn_beta,
                   stride=2, padding=1, tm=None, fused=None,
                   channels_last=False, out_dtype=jnp.float32):
    # NOTE: conv_b is accepted for API parity but is mathematically irrelevant:
    # training-mode BatchNorm subtracts the batch mean, which absorbs the bias.
    del conv_b
    n, cin, _, _ = x.shape
    cout, _, kh, kw = conv_w.shape

    patches, hout, wout = _im2col(x, kh, kw, stride, padding)
    m, k = patches.shape
    kpad = _round_up(k, LANE)
    cpad = _round_up(cout, LANE)

    tm_eff = _choose_tm(m, kpad, cpad, tm)
    m_pad = _round_up(m, tm_eff)
    tiles = m_pad // tm_eff

    # Lane-dense bf16 GEMM operands; zero padding is exact (zero rows/cols add
    # nothing to the GEMM or to the sum/sumsq statistics).
    patches = jnp.pad(patches, ((0, m_pad - m), (0, kpad - k)))
    w_mat = conv_w.transpose(2, 3, 1, 0).reshape(k, cout)                 # (K, Cout)
    w_mat = jnp.pad(w_mat, ((0, kpad - k), (0, cpad - cout))).astype(jnp.bfloat16)
    g_row = jnp.pad(bn_gamma.reshape(1, cout), ((0, 0), (0, cpad - cout)),
                    constant_values=1.0).astype(jnp.float32)
    beta_row = jnp.pad(bn_beta.reshape(1, cout),
                       ((0, 0), (0, cpad - cout))).astype(jnp.float32)

    total_vmem = _total_vmem_bytes()
    usable_vmem = total_vmem - _VMEM_HEADROOM
    out_bytes = jnp.dtype(out_dtype).itemsize

    # Real VMEM terms of the fused kernel: resident f32 scratch + double-buffered
    # patch / output tiles + weight block + margin.
    fused_need = (m_pad * cpad * 4
                  + 2 * tm_eff * kpad * 2
                  + 2 * tm_eff * cpad * out_bytes
                  + 2 * kpad * cpad * 2
                  + (1 << 20))
    if fused is None:
        fused = fused_need <= usable_vmem

    if fused:
        vmem_bytes = int(min(max(fused_need + (4 << 20), 16 << 20), usable_vmem))
        out_flat = pl.pallas_call(
            functools.partial(_fused_kernel, tm=tm_eff, m_total=float(m), eps=BN_EPS),
            out_shape=jax.ShapeDtypeStruct((m_pad, cpad), out_dtype),
            grid=(2, tiles),
            in_specs=[
                # patch tiles: streamed in phase 0, pinned to block 0 in phase 1
                pl.BlockSpec((tm_eff, kpad), lambda p, i: (i * (1 - p), 0)),
                pl.BlockSpec((kpad, cpad), lambda p, i: (0, 0)),
                pl.BlockSpec((1, cpad), lambda p, i: (0, 0)),
                pl.BlockSpec((1, cpad), lambda p, i: (0, 0)),
            ],
            # output tiles only advance during phase 1 -> writeback pipelines
            out_specs=pl.BlockSpec((tm_eff, cpad), lambda p, i: (i * p, 0)),
            scratch_shapes=[pltpu.VMEM((m_pad, cpad), jnp.float32),   # resident conv out
                            pltpu.VMEM((2, cpad), jnp.float32),       # sum / sumsq
                            pltpu.VMEM((2, cpad), jnp.float32)],      # scale / shift
            compiler_params=pltpu.CompilerParams(
                dimension_semantics=("arbitrary", "arbitrary"),
                vmem_limit_bytes=vmem_bytes),
        )(patches, w_mat, g_row, beta_row)
    else:
        ncore = 2 if (tiles % 2 == 0 and tiles >= 2) else 1    # megacore split (v7x)
        tpc = tiles // ncore
        fb_need = (2 * tm_eff * kpad * 2 + 2 * tm_eff * cpad * 2
                   + 2 * kpad * cpad * 2 + (1 << 20))
        vmem_a = int(min(max(fb_need + (4 << 20), 16 << 20), usable_vmem))

        y, stats = pl.pallas_call(
            _gemm_stats_kernel,
            out_shape=(jax.ShapeDtypeStruct((m_pad, cpad), jnp.bfloat16),
                       jax.ShapeDtypeStruct((ncore, 2, cpad), jnp.float32)),
            grid=(ncore, tpc),
            in_specs=[pl.BlockSpec((tm_eff, kpad), lambda c, i: (c * tpc + i, 0)),
                      pl.BlockSpec((kpad, cpad), lambda c, i: (0, 0))],
            out_specs=(pl.BlockSpec((tm_eff, cpad), lambda c, i: (c * tpc + i, 0)),
                       pl.BlockSpec((1, 2, cpad), lambda c, i: (c, 0, 0))),
            compiler_params=pltpu.CompilerParams(
                dimension_semantics=("parallel", "arbitrary"),
                vmem_limit_bytes=vmem_a),
        )(patches, w_mat)

        tot = jnp.sum(stats, axis=0)                  # (2, cpad), tiny XLA reduce
        mean_d = tot[0:1, :] / m
        var = tot[1:2, :] / m - mean_d * mean_d
        scale = jax.lax.rsqrt(var + BN_EPS) * g_row
        shift = beta_row - mean_d * scale             # bias-free (absorbed by BN)

        out_flat = pl.pallas_call(
            _affine_kernel,
            out_shape=jax.ShapeDtypeStruct((m_pad, cpad), out_dtype),
            grid=(tiles,),
            in_specs=[pl.BlockSpec((tm_eff, cpad), lambda i: (i, 0)),
                      pl.BlockSpec((1, cpad), lambda i: (0, 0)),
                      pl.BlockSpec((1, cpad), lambda i: (0, 0))],
            out_specs=pl.BlockSpec((tm_eff, cpad), lambda i: (i, 0)),
            compiler_params=pltpu.CompilerParams(
                dimension_semantics=("parallel",)),
        )(y, scale, shift)

    out = out_flat[:m, :cout].reshape(n, hout, wout, cout)    # NHWC
    if channels_last:
        return out
    # TODO(synk): emit channel-major tiles from the kernel (XLU transpose) so
    # NCHW consumers don't pay this extra XLA transpose pass.
    return out.transpose(0, 3, 1, 2)                          # NCHW to match nn.Module


# ---------------------------------------------------------------------------
# Pure-JAX reference.
# ---------------------------------------------------------------------------
def encode_reference(x, conv_w, conv_b, bn_gamma, bn_beta, stride=2, padding=1):
    z = jnp.where(x > 0, x, LRELU_SLOPE * x)
    z = jax.lax.conv_general_dilated(
        z, conv_w, window_strides=(stride, stride),
        padding=((padding, padding), (padding, padding)),
        dimension_numbers=("NCHW", "OIHW", "NCHW"))
    z = z + conv_b.reshape(1, -1, 1, 1)
    mean = jnp.mean(z, axis=(0, 2, 3), keepdims=True)
    var = jnp.var(z, axis=(0, 2, 3), keepdims=True)
    z = (z - mean) * jax.lax.rsqrt(var + BN_EPS)
    return z * bn_gamma.reshape(1, -1, 1, 1) + bn_beta.reshape(1, -1, 1, 1)


if __name__ == "__main__":
    key = jax.random.PRNGKey(0)
    kx, kw_, kb = jax.random.split(key, 3)

    N, CIN, H, W = 2, 4, 16, 16
    COUT, KH, KW = 8, 4, 4

    x = jax.random.normal(kx, (N, CIN, H, W), dtype=jnp.float32)
    conv_w = jax.random.normal(kw_, (COUT, CIN, KH, KW), dtype=jnp.float32) * 0.1
    conv_b = jax.random.normal(kb, (COUT,), dtype=jnp.float32) * 0.1
    bn_gamma = jnp.ones((COUT,), dtype=jnp.float32)   # BatchNorm2d default affine
    bn_beta = jnp.zeros((COUT,), dtype=jnp.float32)

    ref = encode_reference(x, conv_w, conv_b, bn_gamma, bn_beta)

    # Fused two-phase (single pallas_call, VMEM-resident conv output) path.
    out_fused = jax.block_until_ready(
        encode_forward(x, conv_w, conv_b, bn_gamma, bn_beta, fused=True))
    assert out_fused.shape == (N, COUT, H // 2, W // 2), out_fused.shape
    err = float(jnp.max(jnp.abs(out_fused - ref)))
    assert err < 5e-2, err

    # Tiled two-call fallback (large-M) path — exercised for coverage.
    out_tiled = jax.block_until_ready(
        encode_forward(x, conv_w, conv_b, bn_gamma, bn_beta, fused=False))
    err = float(jnp.max(jnp.abs(out_tiled - ref)))
    assert err < 5e-2, err

    print("KERNEL_OK")
</pallas_src>

<mosaic_0001>
module attributes {stable_mosaic.version = 11 : i64} {
  func.func @_fused_kernel(%arg0: i32, %arg1: i32, %arg2: memref<128x128xbf16, #tpu.memory_space<vmem>>, %arg3: memref<128x128xbf16, #tpu.memory_space<vmem>>, %arg4: memref<1x128xf32, #tpu.memory_space<vmem>>, %arg5: memref<1x128xf32, #tpu.memory_space<vmem>>, %arg6: memref<128x128xf32, #tpu.memory_space<vmem>>, %arg7: memref<128x128xf32, #tpu.memory_space<vmem>>, %arg8: memref<2x128xf32, #tpu.memory_space<vmem>>, %arg9: memref<2x128xf32, #tpu.memory_space<vmem>>) attributes {dimension_semantics = [#tpu.dimension_semantics<arbitrary>, #tpu.dimension_semantics<arbitrary>], iteration_bounds = array<i64: 2, 1>, scalar_prefetch = 0 : i64, scratch_operands = 3 : i64, tpu.core_type = #tpu.core_type<tc>, window_params = [{transform_indices = @transform_0, window_bounds = array<i64: 128, 128>}, {pipeline_mode = #tpu.pipeline_mode<synchronous>, transform_indices = @transform_1, window_bounds = array<i64: 128, 128>}, {pipeline_mode = #tpu.pipeline_mode<synchronous>, transform_indices = @transform_2, window_bounds = array<i64: 1, 128>}, {pipeline_mode = #tpu.pipeline_mode<synchronous>, transform_indices = @transform_3, window_bounds = array<i64: 1, 128>}, {transform_indices = @transform_4, window_bounds = array<i64: 128, 128>}]} {
    %c128_i32 = arith.constant 128 : i32
    %0 = arith.muli %arg1, %c128_i32 : i32
    %1 = tpu.assume_multiple %0, 128 : i32
    %c0_i32 = arith.constant 0 : i32
    %2 = arith.cmpi eq, %arg0, %c0_i32 : i32
    %c0_i32_0 = arith.constant 0 : i32
    %3 = arith.cmpi eq, %arg1, %c0_i32_0 : i32
    %4 = arith.andi %2, %3 : i1
    %5 = arith.extui %4 : i1 to i32
    %c0_i32_1 = arith.constant 0 : i32
    %6 = arith.cmpi ne, %5, %c0_i32_1 : i32
    scf.if %6 {
      %cst = arith.constant 0.000000e+00 : f32
      %18 = vector.broadcast %cst : f32 to vector<2x128xf32>
      %c0 = arith.constant 0 : index
      %c0_8 = arith.constant 0 : index
      %19 = vector.load %arg8[%c0, %c0_8] : memref<2x128xf32, #tpu.memory_space<vmem>>, vector<2x128xf32>
      tpu.vector_store %arg8[%c0, %c0_8], %18 {strides = array<i32>} : memref<2x128xf32, #tpu.memory_space<vmem>>, vector<2x128xf32>,
    } else {
    }
    %c0_i32_2 = arith.constant 0 : i32
    %7 = arith.cmpi eq, %arg0, %c0_i32_2 : i32
    %8 = arith.extui %7 : i1 to i32
    %c0_i32_3 = arith.constant 0 : i32
    %9 = arith.cmpi ne, %8, %c0_i32_3 : i32
    scf.if %9 {
      %c0 = arith.constant 0 : index
      %c0_8 = arith.constant 0 : index
      %18 = vector.load %arg2[%c0, %c0_8] : memref<128x128xbf16, #tpu.memory_space<vmem>>, vector<128x128xbf16>
      %c0_9 = arith.constant 0 : index
      %c0_10 = arith.constant 0 : index
      %19 = vector.load %arg3[%c0_9, %c0_10] : memref<128x128xbf16, #tpu.memory_space<vmem>>, vector<128x128xbf16>
      %cst = arith.constant dense<0.000000e+00> : vector<128x128xf32>
      %20 = tpu.matmul %18, %19, %cst {dimension_numbers = #tpu.dot_dimension_numbers<[1], [0], [0], [1], [0, 0, 1, 1], [], []>} : vector<128x128xbf16>, vector<128x128xbf16>, vector<128x128xf32> -> vector<128x128xf32>
      %21 = arith.index_cast %1 : i32 to index
      %c0_11 = arith.constant 0 : index
      %22 = vector.load %arg7[%21, %c0_11] : memref<128x128xf32, #tpu.memory_space<vmem>>, vector<128x128xf32>
      tpu.vector_store %arg7[%21, %c0_11], %20 {strides = array<i32>} : memref<128x128xf32, #tpu.memory_space<vmem>>, vector<128x128xf32>,
      %c0_12 = arith.constant 0 : index
      %c0_13 = arith.constant 0 : index
      %23 = vector.load %arg8[%c0_12, %c0_13] : memref<2x128xf32, #tpu.memory_space<vmem>>, vector<2x128xf32>
      %cst_14 = arith.constant dense<0.000000e+00> : vector<128xf32>
      %24 = vector.multi_reduction <add>, %20, %cst_14 [0] : vector<128x128xf32> to vector<128xf32>
      %25 = vector.shape_cast %24 : vector<128xf32> to vector<1x128xf32>
      %26 = arith.mulf %20, %20 : vector<128x128xf32>
      %cst_15 = arith.constant dense<0.000000e+00> : vector<128xf32>
      %27 = vector.multi_reduction <add>, %26, %cst_15 [0] : vector<128x128xf32> to vector<128xf32>
      %28 = vector.shape_cast %27 : vector<128xf32> to vector<1x128xf32>
      %29 = tpu.concatenate %25, %28 in 0 : vector<1x128xf32>, vector<1x128xf32> -> vector<2x128xf32>
      %30 = arith.addf %23, %29 : vector<2x128xf32>
      %c0_16 = arith.constant 0 : index
      %c0_17 = arith.constant 0 : index
      %31 = vector.load %arg8[%c0_16, %c0_17] : memref<2x128xf32, #tpu.memory_space<vmem>>, vector<2x128xf32>
      tpu.vector_store %arg8[%c0_16, %c0_17], %30 {strides = array<i32>} : memref<2x128xf32, #tpu.memory_space<vmem>>, vector<2x128xf32>,
    } else {
    }
    %c1_i32 = arith.constant 1 : i32
    %10 = arith.cmpi eq, %arg0, %c1_i32 : i32
    %c0_i32_4 = arith.constant 0 : i32
    %11 = arith.cmpi eq, %arg1, %c0_i32_4 : i32
    %12 = arith.andi %10, %11 : i1
    %13 = arith.extui %12 : i1 to i32
    %c0_i32_5 = arith.constant 0 : i32
    %14 = arith.cmpi ne, %13, %c0_i32_5 : i32
    scf.if %14 {
      %c0 = arith.constant 0 : index
      %c0_8 = arith.constant 0 : index
      %18 = vector.load %arg8[%c0, %c0_8] : memref<2x128xf32, #tpu.memory_space<vmem>>, vector<1x128xf32>
      %cst = arith.constant 7.812500e-03 : f32
      %19 = vector.broadcast %cst : f32 to vector<1x128xf32>
      %20 = arith.mulf %18, %19 : vector<1x128xf32>
      %c1 = arith.constant 1 : index
      %c0_9 = arith.constant 0 : index
      %21 = vector.load %arg8[%c1, %c0_9] : memref<2x128xf32, #tpu.memory_space<vmem>>, vector<1x128xf32>
      %cst_10 = arith.constant 7.812500e-03 : f32
      %22 = vector.broadcast %cst_10 : f32 to vector<1x128xf32>
      %23 = arith.mulf %21, %22 : vector<1x128xf32>
      %24 = arith.mulf %20, %20 : vector<1x128xf32>
      %25 = arith.subf %23, %24 : vector<1x128xf32>
      %cst_11 = arith.constant 9.99999974E-6 : f32
      %26 = vector.broadcast %cst_11 : f32 to vector<1x128xf32>
      %27 = arith.addf %25, %26 : vector<1x128xf32>
      %28 = math.rsqrt %27 : vector<1x128xf32>
      %c0_12 = arith.constant 0 : index
      %c0_13 = arith.constant 0 : index
      %29 = vector.load %arg4[%c0_12, %c0_13] : memref<1x128xf32, #tpu.memory_space<vmem>>, vector<1x128xf32>
      %30 = arith.mulf %28, %29 : vector<1x128xf32>
      %c0_14 = arith.constant 0 : index
      %c0_15 = arith.constant 0 : index
      %31 = vector.load %arg9[%c0_14, %c0_15] : memref<2x128xf32, #tpu.memory_space<vmem>>, vector<1x128xf32>
      tpu.vector_store %arg9[%c0_14, %c0_15], %30 {strides = array<i32>} : memref<2x128xf32, #tpu.memory_space<vmem>>, vector<1x128xf32>,
      %c0_16 = arith.constant 0 : index
      %c0_17 = arith.constant 0 : index
      %32 = vector.load %arg5[%c0_16, %c0_17] : memref<1x128xf32, #tpu.memory_space<vmem>>, vector<1x128xf32>
      %33 = arith.mulf %20, %30 : vector<1x128xf32>
      %34 = arith.subf %32, %33 : vector<1x128xf32>
      %c1_18 = arith.constant 1 : index
      %c0_19 = arith.constant 0 : index
      %35 = vector.load %arg9[%c1_18, %c0_19] : memref<2x128xf32, #tpu.memory_space<vmem>>, vector<1x128xf32>
      tpu.vector_store %arg9[%c1_18, %c0_19], %34 {strides = array<i32>} : memref<2x128xf32, #tpu.memory_space<vmem>>, vector<1x128xf32>,
    } else {
    }
    %c1_i32_6 = arith.constant 1 : i32
    %15 = arith.cmpi eq, %arg0, %c1_i32_6 : i32
    %16 = arith.extui %15 : i1 to i32
    %c0_i32_7 = arith.constant 0 : i32
    %17 = arith.cmpi ne, %16, %c0_i32_7 : i32
    scf.if %17 {
      %18 = arith.index_cast %1 : i32 to index
      %c0 = arith.constant 0 : index
      %19 = vector.load %arg7[%18, %c0] : memref<128x128xf32, #tpu.memory_space<vmem>>, vector<128x128xf32>
      %c0_8 = arith.constant 0 : index
      %c0_9 = arith.constant 0 : index
      %20 = vector.load %arg9[%c0_8, %c0_9] : memref<2x128xf32, #tpu.memory_space<vmem>>, vector<1x128xf32>
      %21 = vector.broadcast %20 : vector<1x128xf32> to vector<128x128xf32>
      %22 = arith.mulf %19, %21 : vector<128x128xf32>
      %c1 = arith.constant 1 : index
      %c0_10 = arith.constant 0 : index
      %23 = vector.load %arg9[%c1, %c0_10] : memref<2x128xf32, #tpu.memory_space<vmem>>, vector<1x128xf32>
      %24 = vector.broadcast %23 : vector<1x128xf32> to vector<128x128xf32>
      %25 = arith.addf %22, %24 : vector<128x128xf32>
      %c0_11 = arith.constant 0 : index
      %c0_12 = arith.constant 0 : index
      %26 = vector.load %arg6[%c0_11, %c0_12] : memref<128x128xf32, #tpu.memory_space<vmem>>, vector<128x128xf32>
      tpu.vector_store %arg6[%c0_11, %c0_12], %25 {strides = array<i32>} : memref<128x128xf32, #tpu.memory_space<vmem>>, vector<128x128xf32>,
    } else {
    }
    return
  }
  func.func @transform_0(%arg0: i32, %arg1: i32) -> (i32, i32) {
    %c1_i32 = arith.constant 1 : i32
    %0 = arith.subi %c1_i32, %arg0 : i32
    %1 = arith.muli %arg1, %0 : i32
    %c0_i32 = arith.constant 0 : i32
    %c0_i32_0 = arith.constant 0 : i32
    return %1, %c0_i32 : i32, i32
  }
  func.func @transform_1(%arg0: i32, %arg1: i32) -> (i32, i32) {
    %c0_i32 = arith.constant 0 : i32
    %c0_i32_0 = arith.constant 0 : i32
    %c0_i32_1 = arith.constant 0 : i32
    return %c0_i32, %c0_i32_0 : i32, i32
  }
  func.func @transform_2(%arg0: i32, %arg1: i32) -> (i32, i32) {
    %c0_i32 = arith.constant 0 : i32
    %c0_i32_0 = arith.constant 0 : i32
    %c0_i32_1 = arith.constant 0 : i32
    return %c0_i32, %c0_i32_0 : i32, i32
  }
  func.func @transform_3(%arg0: i32, %arg1: i32) -> (i32, i32) {
    %c0_i32 = arith.constant 0 : i32
    %c0_i32_0 = arith.constant 0 : i32
    %c0_i32_1 = arith.constant 0 : i32
    return %c0_i32, %c0_i32_0 : i32, i32
  }
  func.func @transform_4(%arg0: i32, %arg1: i32) -> (i32, i32) {
    %0 = arith.muli %arg1, %arg0 : i32
    %c0_i32 = arith.constant 0 : i32
    %c0_i32_0 = arith.constant 0 : i32
    return %0, %c0_i32 : i32, i32
  }
}

</mosaic_0001>

<bundles_post_ra>
// kernel: tpu_custom_call.1
= control target key start
LH: loop header
LB: loop body
LE: loop exit
PB: predicated region body
PF: predicated region fallthrough
CT: control target
= control target key end

     0   :  { %9 = vsyncpa [#allocation6], 0  ;;  %s1255_s0 = inlined_call_operand.hbm [shape: bf16[128,128], index: 0, kind: input, shape index: {}]   ;;  %s1256_s1 = inlined_call_operand.hbm [shape: bf16[128,128], index: 1, kind: input, shape index: {}]   ;;  %s1257_s2 = inlined_call_operand.vmem [shape: f32[1,128], index: 2, kind: input, shape index: {}]   ;;  %s1258_s3 = inlined_call_operand.vmem [shape: f32[1,128], index: 3, kind: input, shape index: {}]   ;;  %s1259_s4 = inlined_call_operand.hbm [shape: f32[128,128], index: 4, kind: output, shape index: {}]  }
   0x1   :  { %11 = vsyncpa [#allocation6 + $0x1], 0 }
   0x2   :  { %12 = vsyncpa [#allocation9], 0 }
   0x3   :  { %13 = vsyncpa [#allocation7], 0 }
   0x4   :  { %15 = vsyncpa [#allocation7 + $0x1], 0  ;;  %s1115_s15 = smov 0   ;;  %s1117_s16 = smov 0  }
   0x5   :  { %s1119_s17 = smov 0  }
   0x6 LB: > { %s781_s18 = sadd.s32 4294967295, %s1080_s17   ;;  %s782_s19 = sadd.s32 4294967294, %s1080_s17   ;;  %s1080_s17 = sphi %s1119_s17, %s21_s17   ;;  %s1076_s16 = sphi %s1117_s16, %s1274_s16   ;;  %s1072_s15 = sphi %s1115_s15, %s1273_s15  }
   0x7   : > { %s33_s20 = sadd.s32 1, %s1076_s16  ;;  %p783_p0 = scmp.ge.s32.totalorder %s1080_s17, 1 }
   0x8   : > { %p35_p1 = scmp.ge.s32.totalorder %s33_s20, 2  ;;  %p159_p2 = scmp.lt.s32.totalorder %s1080_s17, 3 }
   0x9   : > { %p1137_p3 = scmp.eq.s32.totalorder %s781_s18, 0  ;;  %s1082_s23 = smov [#allocation8]  }
   0xa   : > { %s1276_s20 = smov (%p35_p1, %s33_s20), 0  ;;  %p1143_p4 = pnand %p783_p0, %p159_p2 }
   0xb   : > { %s1263_s21 = scalar_select %p1137_p3, 1, 0 }
   0xc   : > { %s1264_s22 = scalar_select %p1143_p4, 1, 0 }
   0xd   : > { %s171_s24 = sshll.u32 %s1082_s23, 4  ;;  %p894_p5 = pneg %p1143_p4  ;;  %s172_s24 = int_to_ptr.vmem [resolvable:$true] %s171_s24 }
   0xe   : > { %s964_s28 = scalar_lea.hbm %s1256_s1, 1024 }
   0xf   : > { %p1152_p7 = pnand %p1137_p3, %p894_p5  ;;  %p965_p10 = scmp.ne.s32.totalorder %s1256_s1, %s964_s28 }
  0x10   : > { %p971_p0 = scmp.lt.u32.totalorder %s964_s28, %s1256_s1 }
  0x11   : > { %p966_p11 = pneg %p1152_p7 }
  0x13   : > { %p967_p12 = pnand %p966_p11, %p965_p10 }
  0x15   : > { %p968_p13 = pneg %p967_p12 }
  0x17   : > { %p973_p1 = pnand %p971_p0, %p968_p13 }
  0x19   : > { %976 = shalt.err (!%p973_p1)
}
  0x1a   : > { %s977_s7 = scalar_lea.vmem %s172_s24, 1024  ;;  %p985_p9 = scmp.lt.s32.totalorder %s172_s24, %s172_s24 }
  0x1b   : > { %p978_p2 = scmp.ne.s32.totalorder %s172_s24, %s977_s7  ;;  %p986_p8 = scmp.lt.s32.totalorder %s977_s7, %s977_s7 }
  0x1d   : > { %p980_p5 = pnand %p978_p2, %p966_p11  ;;  %p987_p3 = por %p986_p8, %p985_p9 }
  0x1f   : > { %p981_p6 = pneg %p980_p5 }
  0x21   : > { %p988_p4 = pnand %p987_p3, %p981_p6 }
  0x23   : > { %991 = shalt.err (!%p988_p4)
}
  0x24   : > { %s1083_s8 = smov 64   ;;  %s1084_s9 = smov 4  }
  0x25   : > { %897 = dma.hbm_to_vmem [thread:$0]  (!%p1152_p7), %s1256_s1, 1024, %s172_s24, [#allocation9], %s1083_s8, %s1083_s8, %s1084_s9  }
  0x26   : > { %s1085_s12 = smov [#allocation5]   ;;  %p1266_p10 = scmp.lt.s32.totalorder %s1080_s17, 2 }
  0x27   : > { %s204_s13 = sshll.u32 %s1085_s12, 4  ;;  %p1267_p11 = scmp.eq.s32.totalorder %s1080_s17, 0  ;;  %s205_s13 = int_to_ptr.vmem [resolvable:$true] %s204_s13 }
  0x28   : > { %s992_s27 = scalar_lea.hbm %s1255_s0, 1024 }
  0x29   : > { %p1178_p12 = pnand %p1267_p11, %p1266_p10  ;;  %p993_p3 = scmp.ne.s32.totalorder %s1255_s0, %s992_s27 }
  0x2a   : > { %p999_p8 = scmp.lt.u32.totalorder %s992_s27, %s1255_s0 }
  0x2b   : > { %p994_p4 = pneg %p1178_p12 }
  0x2d   : > { %p995_p6 = pnand %p994_p4, %p993_p3 }
  0x2f   : > { %p996_p7 = pneg %p995_p6 }
  0x31   : > { %p1001_p9 = pnand %p999_p8, %p996_p7 }
  0x33   : > { %1004 = shalt.err (!%p1001_p9)
}
  0x34   : > { %s1005_s30 = scalar_lea.vmem %s205_s13, 1024  ;;  %s1012_s5 = scalar_lea.vmem %s205_s13, 2048 }
  0x35   : > { %p1006_p13 = scmp.ne.s32.totalorder %s205_s13, %s1005_s30  ;;  %p1013_p2 = scmp.lt.s32.totalorder %s205_s13, %s205_s13 }
  0x36   : > { %p1014_p5 = scmp.lt.s32.totalorder %s1012_s5, %s1005_s30 }
  0x37   : > { %p1008_p0 = pnand %p1006_p13, %p994_p4 }
  0x38   : > { %p1015_p10 = por %p1014_p5, %p1013_p2 }
  0x39   : > { %p1009_p1 = pneg %p1008_p0 }
  0x3b   : > { %p1016_p11 = pnand %p1015_p10, %p1009_p1 }
  0x3d   : > { %1019 = shalt.err (!%p1016_p11)
}
  0x3e   : > { %901 = dma.hbm_to_vmem [thread:$0]  (!%p1178_p12), %s1255_s0, 1024, %s205_s13, [#allocation6], %s1083_s8, %s1083_s8, %s1084_s9  }
  0x3f   : > { %p1269_p3 = scmp.ne.s32.totalorder %s1264_s22, 0 }
  0x40   : > { %p1270_p6 = scmp.ne.s32.totalorder (!%p1269_p3), %s1263_s21, 0 }
  0x41   : > { %216 = sbr.rel (%p1269_p3) target bundleno = 455 (0x1c7), region = 36 }
  0x48   : > { %1059 = dma.done.wait (%p1270_p6), [#allocation6], 1024  }
  0x49   : > { %1061 = vsyncadd (%p1270_p6), [#allocation6], 4294966272 }
  0x4a   : > { %1063 = dma.done.wait (%p1270_p6), [#allocation9], 1024  }
  0x4b   : > { %1065 = vsyncadd (%p1270_p6), [#allocation9], 4294966272  ;;  %p258_p4 = scmp.eq.s32.totalorder %s1072_s15, 0 }
  0x4c   : > { %v1086_v0 = vmov (%p258_p4), 0.0  }
  0x4d   : > { %263 = sbr.rel (!%p258_p4) target bundleno = 84 (0x54), region = 48  ;;  %264 = vst [vmem:[#allocation3] sm:$0x3] (%p258_p4), %v1086_v0 }
  0x54 PF: > { %p791_p12 = scmp.ne.s32.totalorder %s1072_s15, 0 }
  0x55   : > { %v946_v1 = vld [vmem:[#allocation8] sm:$0xff] (!%p791_p12)   ;;  %v947_v2 = vld [vmem:[#allocation8 + $0x8] sm:$0xff] (!%p791_p12)   ;;  %v948_v3 = vld [vmem:[#allocation8 + $0x10] sm:$0xff] (!%p791_p12)   ;;  %vm569_vm0 = vcmask (!%p791_p12), 1040384  }
  0x56   : > { %267 = sbr.rel (%p791_p12) target bundleno = 381 (0x17d), region = 52  ;;  %834 = vmatprep.subr.bf16.mxu0 (!%p791_p12), %v946_v1  ;;  %866 = vmatprep.subr.bf16.mxu1 (!%p791_p12), %v946_v1  ;;  %v949_v4 = vld [vmem:[#allocation8 + $0x18] sm:$0xff] (!%p791_p12)   ;;  %v954_v5 = vld [vmem:[#allocation5] sm:$0xff] (!%p791_p12)   ;;  %v951_v8 = vld [vmem:[#allocation8 + $0x28] sm:$0xff] (!%p791_p12)  }
  0x57   : > { %835 = vmatpush3.bf16.msra.mxu0 (!%p791_p12), %v946_v1  ;;  %874 = vmatpush3.bf16.msra.mxu1 (!%p791_p12), %v946_v1  ;;  %v950_v6 = vld [vmem:[#allocation8 + $0x20] sm:$0xff] (!%p791_p12)   ;;  %v952_v9 = vld [vmem:[#allocation8 + $0x30] sm:$0xff] (!%p791_p12)   ;;  %v953_v10 = vld [vmem:[#allocation8 + $0x38] sm:$0xff] (!%p791_p12)  }
  0x58   : > { %836 = vmatprep.subr.bf16.mxu0 (!%p791_p12), %v947_v2  ;;  %867 = vmatprep.subr.bf16.mxu1 (!%p791_p12), %v947_v2  ;;  %v958_v7 = vld [vmem:[#allocation5 + $0x20] sm:$0xff] (!%p791_p12)   ;;  %v955_v11 = vld [vmem:[#allocation5 + $0x8] sm:$0xff] (!%p791_p12)   ;;  %v956_v13 = vld [vmem:[#allocation5 + $0x10] sm:$0xff] (!%p791_p12)  }
  0x59   : > { %850 = vmatprep.mubr.bf16.mxu0 (!%p791_p12), %v954_v5  ;;  %858 = vmatprep.mubr.bf16.mxu1 (!%p791_p12), %v958_v7  ;;  %v959_v12 = vld [vmem:[#allocation5 + $0x28] sm:$0xff] (!%p791_p12)   ;;  %v960_v14 = vld [vmem:[#allocation5 + $0x30] sm:$0xff] (!%p791_p12)   ;;  %v957_v15 = vld [vmem:[#allocation5 + $0x18] sm:$0xff] (!%p791_p12)  }
  0x5a   : > { %v961_v16 = vld [vmem:[#allocation5 + $0x38] sm:$0xff] (!%p791_p12)  }
  0x5b   : > { %837 = vmatpush3.bf16.msra.mxu0 (!%p791_p12), %v947_v2  ;;  %875 = vmatpush3.bf16.msra.mxu1 (!%p791_p12), %v947_v2 }
  0x5c   : > { %838 = vmatprep.subr.bf16.mxu0 (!%p791_p12), %v948_v3  ;;  %868 = vmatprep.subr.bf16.mxu1 (!%p791_p12), %v948_v3 }
  0x5f   : > { %839 = vmatpush3.bf16.msra.mxu0 %v948_v3  ;;  %876 = vmatpush3.bf16.msra.mxu1 %v948_v3 }
  0x60   : > { %840 = vmatprep.subr.bf16.mxu0 %v949_v4  ;;  %869 = vmatprep.subr.bf16.mxu1 %v949_v4 }
  0x63   : > { %841 = vmatpush3.bf16.msra.mxu0 %v949_v4  ;;  %877 = vmatpush3.bf16.msra.mxu1 %v949_v4 }
  0x64   : > { %842 = vmatprep.subr.bf16.mxu0 %v950_v6  ;;  %870 = vmatprep.subr.bf16.mxu1 %v950_v6 }
  0x67   : > { %843 = vmatpush3.bf16.msra.mxu0 %v950_v6  ;;  %878 = vmatpush3.bf16.msra.mxu1 %v950_v6 }
  0x68   : > { %844 = vmatprep.subr.bf16.mxu0 %v951_v8  ;;  %871 = vmatprep.subr.bf16.mxu1 %v951_v8 }
  0x6b   : > { %845 = vmatpush3.bf16.msra.mxu0 %v951_v8  ;;  %879 = vmatpush3.bf16.msra.mxu1 %v951_v8 }
  0x6c   : > { %846 = vmatprep.subr.bf16.mxu0 %v952_v9  ;;  %872 = vmatprep.subr.bf16.mxu1 %v952_v9 }
  0x6f   : > { %847 = vmatpush3.bf16.msra.mxu0 %v952_v9  ;;  %880 = vmatpush3.bf16.msra.mxu1 %v952_v9 }
  0x70   : > { %848 = vmatprep.subr.bf16.mxu0 %v953_v10  ;;  %873 = vmatprep.subr.bf16.mxu1 %v953_v10 }
  0x73   : > { %849 = vmatpush3.bf16.msra.mxu0 %v953_v10  ;;  %881 = vmatpush3.bf16.msra.mxu1 %v953_v10 }
  0x76   : > { %851 = vmatmul.mubr.bf16.vlgmr.msra.gmra.mrb[0].mxu0 %v955_v11  ;;  %859 = vmatmul.mubr.bf16.vlgmr.msra.gmra.mrb[0].mxu1 %v959_v12 }
  0x77   : > { %854 = vmatprep.mubr.bf16.mxu0 %v956_v13  ;;  %862 = vmatprep.mubr.bf16.mxu1 %v960_v14 }
  0x7e   : > { %855 = vmatmul.mubr.bf16.gmra.mrb[4].mxu0 %v957_v15  ;;  %863 = vmatmul.mubr.bf16.gmra.mrb[4].mxu1 %v961_v16 }
 0x149   : > { %v852_v17 = vpop.f32.mrb[0].mxu0  ;;  %v860_v18 = vpop.f32.mrb[0].mxu1 }
 0x14a   : > { %496 = vst [vmem:[#allocation2 + $0x10] sm:$0xff] %v852_v17  ;;  %v430_v19 = vpop.f32.mrb[1].mxu0  ;;  %504 = vst [vmem:[#allocation2 + $0x50] sm:$0xff] %v860_v18  ;;  %v462_v20 = vpop.f32.mrb[1].mxu1  ;;  %v534_v28 = vmul.f32 %v852_v17, %v852_v17  ;;  %v542_v60 = vmul.f32 %v860_v18, %v860_v18 }
 0x14b   : > { %494 = vst [vmem:[#allocation2] sm:$0xff] %v430_v19  ;;  %v853_v21 = vpop.f32.mrb[2].mxu0  ;;  %502 = vst [vmem:[#allocation2 + $0x40] sm:$0xff] %v462_v20  ;;  %v861_v22 = vpop.f32.mrb[2].mxu1  ;;  %v532_v25 = vmul.f32 %v430_v19, %v430_v19  ;;  %v540_v54 = vmul.f32 %v462_v20, %v462_v20 }
 0x14c   : > { %497 = vst [vmem:[#allocation2 + $0x18] sm:$0xff] %v853_v21  ;;  %v433_v23 = vpop.f32.mrb[3].mxu0  ;;  %505 = vst [vmem:[#allocation2 + $0x58] sm:$0xff] %v861_v22  ;;  %v465_v24 = vpop.f32.mrb[3].mxu1  ;;  %v535_v31 = vmul.f32 %v853_v21, %v853_v21  ;;  %v543_v63 = vmul.f32 %v861_v22, %v861_v22 }
 0x14d   : > { %495 = vst [vmem:[#allocation2 + $0x8] sm:$0xff] %v433_v23  ;;  %v511_v26 = vadd.f32 %v433_v23, %v430_v19  ;;  %v533_v27 = vmul.f32 %v433_v23, %v433_v23  ;;  %503 = vst [vmem:[#allocation2 + $0x48] sm:$0xff] %v465_v24  ;;  %v541_v59 = vmul.f32 %v465_v24, %v465_v24 }
 0x14f   : > { %v512_v29 = vadd.f32 %v852_v17, %v511_v26  ;;  %v548_v30 = vadd.f32 %v533_v27, %v532_v25  ;;  %v510_v25 = vld [vmem:[#allocation3] sm:$0x3] }
 0x151   : > { %v549_v32 = vadd.f32 %v548_v30, %v534_v28  ;;  %v856_v33 = vpop.f32.mrb[4].mxu0  ;;  %v513_v34 = vadd.f32 %v853_v21, %v512_v29  ;;  %v864_v35 = vpop.f32.mrb[4].mxu1 }
 0x152   : > { %500 = vst [vmem:[#allocation2 + $0x30] sm:$0xff] %v856_v33  ;;  %v446_v36 = vpop.f32.mrb[5].mxu0  ;;  %508 = vst [vmem:[#allocation2 + $0x70] sm:$0xff] %v864_v35  ;;  %v478_v37 = vpop.f32.mrb[5].mxu1  ;;  %v538_v48 = vmul.f32 %v856_v33, %v856_v33  ;;  %v546_v8 = vmul.f32 %v864_v35, %v864_v35 }
 0x153   : > { %498 = vst [vmem:[#allocation2 + $0x20] sm:$0xff] %v446_v36  ;;  %v514_v38 = vadd.f32 %v513_v34, %v446_v36  ;;  %v536_v39 = vmul.f32 %v446_v36, %v446_v36  ;;  %v550_v40 = vadd.f32 %v549_v32, %v535_v31  ;;  %v857_v41 = vpop.f32.mrb[6].mxu0  ;;  %506 = vst [vmem:[#allocation2 + $0x60] sm:$0xff] %v478_v37  ;;  %v865_v42 = vpop.f32.mrb[6].mxu1 }
 0x154   : > { %501 = vst [vmem:[#allocation2 + $0x38] sm:$0xff] %v857_v41  ;;  %v449_v43 = vpop.f32.mrb[7].mxu0  ;;  %509 = vst [vmem:[#allocation2 + $0x78] sm:$0xff] %v865_v42  ;;  %v481_v44 = vpop.f32.mrb[7].mxu1  ;;  %v539_v51 = vmul.f32 %v857_v41, %v857_v41  ;;  %v544_v2 = vmul.f32 %v478_v37, %v478_v37  ;;  %v547_v11 = vmul.f32 %v865_v42, %v865_v42 }
 0x155   : > { %v551_v45 = vadd.f32 %v550_v40, %v536_v39  ;;  %499 = vst [vmem:[#allocation2 + $0x28] sm:$0xff] %v449_v43  ;;  %v515_v46 = vadd.f32 %v514_v38, %v449_v43  ;;  %v537_v47 = vmul.f32 %v449_v43, %v449_v43  ;;  %507 = vst [vmem:[#allocation2 + $0x68] sm:$0xff] %v481_v44 }
 0x156   : > { %v545_v7 = vmul.f32 %v481_v44, %v481_v44 }
 0x157   : > { %v516_v49 = vadd.f32 %v856_v33, %v515_v46  ;;  %v552_v50 = vadd.f32 %v551_v45, %v537_v47 }
 0x159   : > { %v553_v52 = vadd.f32 %v552_v50, %v538_v48  ;;  %v517_v53 = vadd.f32 %v857_v41, %v516_v49 }
 0x15b   : > { %v518_v55 = vadd.f32 %v517_v53, %v462_v20  ;;  %v554_v56 = vadd.f32 %v553_v52, %v539_v51 }
 0x15d   : > { %v555_v57 = vadd.f32 %v554_v56, %v540_v54  ;;  %v519_v58 = vadd.f32 %v518_v55, %v465_v24 }
 0x15f   : > { %v520_v61 = vadd.f32 %v860_v18, %v519_v58  ;;  %v556_v62 = vadd.f32 %v555_v57, %v541_v59 }
 0x161   : > { %v557_v0 = vadd.f32 %v556_v62, %v542_v60  ;;  %v521_v1 = vadd.f32 %v861_v22, %v520_v61 }
 0x163   : > { %v522_v3 = vadd.f32 %v521_v1, %v478_v37  ;;  %v558_v4 = vadd.f32 %v557_v0, %v543_v63 }
 0x165   : > { %v559_v5 = vadd.f32 %v558_v4, %v544_v2  ;;  %v523_v6 = vadd.f32 %v522_v3, %v481_v44 }
 0x167   : > { %v524_v9 = vadd.f32 %v864_v35, %v523_v6  ;;  %v560_v10 = vadd.f32 %v559_v5, %v545_v7 }
 0x169   : > { %v525_v12 = vadd.f32 %v865_v42, %v524_v9  ;;  %v561_v13 = vadd.f32 %v560_v10, %v546_v8 }
 0x16b   : > { %v526_v14 = vrot.slane %v525_v12, 4  ;;  %v562_v15 = vadd.f32 %v561_v13, %v547_v11 }
 0x16d   : > { %v527_v16 = vadd.f32 %v526_v14, %v525_v12  ;;  %v563_v17 = vrot.slane %v562_v15, 4 }
 0x16f   : > { %v528_v18 = vrot.slane %v527_v16, 2  ;;  %v564_v19 = vadd.f32 %v563_v17, %v562_v15 }
 0x171   : > { %v529_v20 = vadd.f32 %v528_v18, %v527_v16  ;;  %v565_v21 = vrot.slane %v564_v19, 2 }
 0x173   : > { %v530_v22 = vrot.slane %v529_v20, 1  ;;  %v566_v23 = vadd.f32 %v565_v21, %v564_v19 }
 0x175   : > { %v567_v24 = vrot.slane %v566_v23, 1  ;;  %v531_v26 = vadd.f32 %v530_v22, %v529_v20 }
 0x177   : > { %v568_v27 = vadd.f32 %v567_v24, %v566_v23 }
 0x179   : > { %v570_v28 = vsel %vm569_vm0, %v531_v26, %v568_v27 }
 0x17a   : > { %v571_v29 = vadd.f32 %v570_v28, %v510_v25 }
 0x17c   : > { %572 = vst [vmem:[#allocation3] sm:$0x3] %v571_v29 }
 0x17d PF: > { %p573_p7 = scmp.eq.s32.totalorder %s1072_s15, 1 }
 0x17e   : > { %v586_v37 = vld [vmem:[%s1257_s2] sm:$0x1] (%p573_p7) }
 0x17f   : > { %577 = sbr.rel (!%p573_p7) target bundleno = 414 (0x19e), region = 56  ;;  %v589_v40 = vld [vmem:[%s1258_s3] sm:$0x1] (%p573_p7) }
 0x183   : > { %v578_v30 = vld [vmem:[#allocation3] sm:$0x1] (%p573_p7)  ;;  %v580_v31 = vld [vmem:[#allocation3 + $0x1] sm:$0x1] (%p573_p7) }
 0x184   : > { %v579_v32 = vmul.f32 (%p573_p7), 0.0078125, %v578_v30  ;;  %v581_v33 = vmul.f32 (%p573_p7), 0.0078125, %v580_v31 }
 0x186   : > { %v582_v34 = vmul.f32 %v579_v32, %v579_v32 }
 0x188   : > { %v583_v35 = vsub.f32 %v581_v33, %v582_v34 }
 0x18a   : > { %v584_v36 = vadd.f32 1e-05, %v583_v35 }
 0x18c   : > { %962 = vrsqrt.f32 %v584_v36 }
 0x196   : > { %v963_v38 = vpop.eup %962 }
 0x197   : > { %v587_v39 = vmul.f32 %v963_v38, %v586_v37 }
 0x199   : > { %588 = vst [vmem:[#allocation4] sm:$0x1] %v587_v39  ;;  %v590_v41 = vmul.f32 %v587_v39, %v579_v32 }
 0x19b   : > { %v591_v42 = vsub.f32 %v589_v40, %v590_v41 }
 0x19d   : > { %592 = vst [vmem:[#allocation4 + $0x1] sm:$0x1] %v591_v42 }
 0x19e PF: > { %p809_p8 = scmp.ne.s32.totalorder %s1072_s15, 1 }
 0x19f   : > { %v597_v43 = vld [vmem:[#allocation2] sm:$0xff] (!%p809_p8)  ;;  %v598_v47 = vld [vmem:[#allocation2 + $0x8] sm:$0xff] (!%p809_p8)  ;;  %v599_v48 = vld [vmem:[#allocation2 + $0x10] sm:$0xff] (!%p809_p8) }
 0x1a0   : > { %595 = sbr.rel (%p809_p8) target bundleno = 431 (0x1af), region = 60  ;;  %v810_v44 = vld [vmem:[#allocation4] ss:$0 sm:$0xff] (!%p809_p8)  ;;  %v600_v49 = vld [vmem:[#allocation2 + $0x18] sm:$0xff] (!%p809_p8)  ;;  %v602_v54 = vld [vmem:[#allocation2 + $0x28] sm:$0xff] (!%p809_p8) }
 0x1a1   : > { %v618_v46 = vmul.f32 (!%p809_p8), %v810_v44, %v597_v43  ;;  %v619_v50 = vmul.f32 (!%p809_p8), %v810_v44, %v598_v47  ;;  %v620_v51 = vmul.f32 (!%p809_p8), %v810_v44, %v599_v48  ;;  %v621_v52 = vmul.f32 (!%p809_p8), %v810_v44, %v600_v49  ;;  %v601_v53 = vld [vmem:[#allocation2 + $0x20] sm:$0xff] (!%p809_p8)  ;;  %v603_v55 = vld [vmem:[#allocation2 + $0x30] sm:$0xff] (!%p809_p8)  ;;  %v604_v60 = vld [vmem:[#allocation2 + $0x38] sm:$0xff] (!%p809_p8) }
 0x1a2   : > { %v622_v57 = vmul.f32 (!%p809_p8), %v810_v44, %v601_v53  ;;  %v623_v58 = vmul.f32 (!%p809_p8), %v810_v44, %v602_v54  ;;  %v624_v59 = vmul.f32 (!%p809_p8), %v810_v44, %v603_v55  ;;  %v605_v61 = vld [vmem:[#allocation2 + $0x40] sm:$0xff] (!%p809_p8)  ;;  %v606_v62 = vld [vmem:[#allocation2 + $0x48] sm:$0xff] (!%p809_p8)  ;;  %v625_v2 = vmul.f32 (!%p809_p8), %v810_v44, %v604_v60  ;;  %v607_v3 = vld [vmem:[#allocation2 + $0x50] sm:$0xff] (!%p809_p8) }
 0x1a3   : > { %v608_v4 = vld [vmem:[#allocation2 + $0x58] sm:$0xff] (!%p809_p8)  ;;  %v609_v5 = vld [vmem:[#allocation2 + $0x60] sm:$0xff] (!%p809_p8)  ;;  %v626_v9 = vmul.f32 (!%p809_p8), %v810_v44, %v605_v61  ;;  %v610_v10 = vld [vmem:[#allocation2 + $0x68] sm:$0xff] (!%p809_p8)  ;;  %v627_v14 = vmul.f32 (!%p809_p8), %v810_v44, %v606_v62  ;;  %v628_v15 = vmul.f32 (!%p809_p8), %v810_v44, %v607_v3 }
 0x1a4   : > { %v811_v45 = vld [vmem:[#allocation4 + $0x1] ss:$0 sm:$0xff] (!%p809_p8)  ;;  %v611_v11 = vld [vmem:[#allocation2 + $0x70] sm:$0xff] (!%p809_p8)  ;;  %v612_v12 = vld [vmem:[#allocation2 + $0x78] sm:$0xff] (!%p809_p8)  ;;  %v629_v16 = vmul.f32 (!%p809_p8), %v810_v44, %v608_v4  ;;  %v630_v18 = vmul.f32 (!%p809_p8), %v810_v44, %v609_v5  ;;  %v631_v19 = vmul.f32 (!%p809_p8), %v810_v44, %v610_v10 }
 0x1a5   : > { %v639_v56 = vadd.f32 (!%p809_p8), %v811_v45, %v618_v46  ;;  %v640_v63 = vadd.f32 (!%p809_p8), %v811_v45, %v619_v50  ;;  %v641_v0 = vadd.f32 (!%p809_p8), %v811_v45, %v620_v51  ;;  %v642_v1 = vadd.f32 (!%p809_p8), %v811_v45, %v621_v52 }
 0x1a6   : > { %v643_v6 = vadd.f32 (!%p809_p8), %v811_v45, %v622_v57  ;;  %v644_v7 = vadd.f32 (!%p809_p8), %v811_v45, %v623_v58  ;;  %v645_v8 = vadd.f32 (!%p809_p8), %v811_v45, %v624_v59  ;;  %v646_v13 = vadd.f32 (!%p809_p8), %v811_v45, %v625_v2 }
 0x1a7   : > { %655 = vst [vmem:[#allocation10] sm:$0xff] %v639_v56  ;;  %656 = vst [vmem:[#allocation10 + $0x8] sm:$0xff] %v640_v63  ;;  %v647_v17 = vadd.f32 %v811_v45, %v626_v9  ;;  %v632_v20 = vmul.f32 %v810_v44, %v611_v11  ;;  %v648_v21 = vadd.f32 %v811_v45, %v627_v14 }
 0x1a8   : > { %657 = vst [vmem:[#allocation10 + $0x10] sm:$0xff] %v641_v0  ;;  %658 = vst [vmem:[#allocation10 + $0x18] sm:$0xff] %v642_v1  ;;  %v649_v22 = vadd.f32 %v811_v45, %v628_v15  ;;  %v650_v23 = vadd.f32 %v811_v45, %v629_v16  ;;  %v633_v24 = vmul.f32 %v810_v44, %v612_v12 }
 0x1a9   : > { %659 = vst [vmem:[#allocation10 + $0x20] sm:$0xff] %v643_v6  ;;  %660 = vst [vmem:[#allocation10 + $0x28] sm:$0xff] %v644_v7  ;;  %v651_v25 = vadd.f32 %v811_v45, %v630_v18  ;;  %v652_v26 = vadd.f32 %v811_v45, %v631_v19  ;;  %v653_v27 = vadd.f32 %v811_v45, %v632_v20 }
 0x1aa   : > { %661 = vst [vmem:[#allocation10 + $0x30] sm:$0xff] %v645_v8  ;;  %662 = vst [vmem:[#allocation10 + $0x38] sm:$0xff] %v646_v13  ;;  %v654_v28 = vadd.f32 %v811_v45, %v633_v24 }
 0x1ab   : > { %663 = vst [vmem:[#allocation10 + $0x40] sm:$0xff] %v647_v17  ;;  %664 = vst [vmem:[#allocation10 + $0x48] sm:$0xff] %v648_v21 }
 0x1ac   : > { %665 = vst [vmem:[#allocation10 + $0x50] sm:$0xff] %v649_v22  ;;  %666 = vst [vmem:[#allocation10 + $0x58] sm:$0xff] %v650_v23 }
 0x1ad   : > { %667 = vst [vmem:[#allocation10 + $0x60] sm:$0xff] %v651_v25  ;;  %668 = vst [vmem:[#allocation10 + $0x68] sm:$0xff] %v652_v26 }
 0x1ae   : > { %669 = vst [vmem:[#allocation10 + $0x70] sm:$0xff] %v653_v27  ;;  %670 = vst [vmem:[#allocation10 + $0x78] sm:$0xff] %v654_v28 }
 0x1af PF: > { %p1220_p9 = scmp.eq.s32.totalorder %s781_s18, 1  ;;  %s1087_s10 = smov [#allocation10]  }
 0x1b0   : > { %s686_s11 = sshll.u32 %s1087_s10, 4  ;;  %s687_s11 = int_to_ptr.vmem [resolvable:$true] %s686_s11 }
 0x1b1   : > { %s1020_s12 = scalar_lea.vmem %s687_s11, 2048  ;;  %s1026_s13 = scalar_lea.vmem %s687_s11, 4096 }
 0x1b2   : > { %p1021_p13 = scmp.ne.s32.totalorder %s687_s11, %s1020_s12  ;;  %p1027_p2 = scmp.lt.s32.totalorder %s687_s11, %s687_s11 }
 0x1b3   : > { %p1028_p5 = scmp.lt.s32.totalorder %s1026_s13, %s1020_s12 }
 0x1b4   : > { %p1022_p0 = pnand %p1021_p13, %p1220_p9 }
 0x1b5   : > { %p1029_p10 = por %p1028_p5, %p1027_p2 }
 0x1b6   : > { %p1023_p1 = pneg %p1022_p0 }
 0x1b8   : > { %p1030_p11 = pnand %p1029_p10, %p1023_p1 }
 0x1ba   : > { %1033 = shalt.err (!%p1030_p11)
}
 0x1bb   : > { %s1034_s23 = scalar_lea.hbm %s1259_s4, 2048 }
 0x1bc   : > { %p1035_p3 = scmp.ne.s32.totalorder %s1259_s4, %s1034_s23  ;;  %p1040_p12 = scmp.lt.u32.totalorder %s1034_s23, %s1259_s4 }
 0x1be   : > { %p1036_p6 = pnand %p1035_p3, %p1220_p9 }
 0x1c0   : > { %p1037_p4 = pneg %p1036_p6 }
 0x1c2   : > { %p1042_p7 = pnand %p1040_p12, %p1037_p4 }
 0x1c4   : > { %1045 = shalt.err (!%p1042_p7)
}
 0x1c5   : > { %s1088_s24 = smov 128   ;;  %s1089_s29 = smov 8  }
 0x1c6   : > { %891 = dma.vmem_to_hbm [thread:$0]  (%p1220_p9), %s687_s11, 2048, %s1259_s4, [#allocation7], %s1088_s24, %s1088_s24, %s1089_s29  }
 0x1c7 PF: > { %p913_p8 = scmp.eq.s32.totalorder %s782_s19, 1  ;;  %p1272_p13 = scmp.ge.s32.totalorder %s1080_s17, 2 }
 0x1c9   : > { %p903_p0 = pnand %p913_p8, %p1272_p13 }
 0x1cb   : > { %1067 = dma.done.wait (!%p903_p0), [#allocation7], 2048  }
 0x1cc   : > { %1069 = vsyncadd (!%p903_p0), [#allocation7], 4294965248  ;;  %s21_s17 = sadd.s32 1, %s1080_s17   ;;  %s1273_s15 = smov %s1076_s16 }
 0x1cd   : > { %p18_p1 = scmp.ge.s32.totalorder %s21_s17, 4   ;;  %s1274_s16 = smov %s1276_s20 }
 0x1cf   :  { %20 = sbr.rel (!%p18_p1) target bundleno = 6 (0x6), region = 103 }
 0x1d6   :  { %707 = vsyncpa [#allocation6], 1 }
 0x1d7   :  { %709 = vsyncpa [#allocation6 + $0x1], 1 }
 0x1d8   :  { %710 = vsyncpa [#allocation9], 1 }
 0x1d9   :  { %711 = vsyncpa [#allocation7], 1 }
 0x1da   :  { %713 = vsyncpa [#allocation7 + $0x1], 1 }

</bundles_post_ra>
